<compile_context>
chip_gen: v7x
topology: tpu7x:2x2x1
jax: 0.10.0
libtpu: 0.0.40
codegen_flags: <defaults>
</compile_context>

<pallas_src>
import math
import functools

import jax
import jax.numpy as jnp
from jax.experimental import pallas as pl
from jax.experimental.pallas import tpu as pltpu


# ---------------------------------------------------------------------------
# Pallas kernel: fused matmul + bias + LeakyReLU(0.1), bf16 out, f32 accumulate
# ---------------------------------------------------------------------------

def _deconv_matmul_kernel(x_ref, w_ref, b_ref, o_ref):
    """o = leaky_relu(bf16(x) @ W + b, 0.1) for one (tile_m, n_pad) output tile."""
    a = x_ref[...].astype(jnp.bfloat16)          # in-register cast (no extra HBM pass)
    acc = jnp.dot(a, w_ref[...], preferred_element_type=jnp.float32)
    acc = acc + b_ref[...]                       # (1, n_pad) broadcast over rows
    acc = jnp.maximum(acc, 0.1 * acc)            # LeakyReLU(negative_slope=0.1)
    o_ref[...] = acc.astype(o_ref.dtype)         # bf16 store (lane-dense, unmasked)


# ---------------------------------------------------------------------------
# Row-tile selection: divisor of M when possible, VMEM-budgeted, >=2 grid steps
# ---------------------------------------------------------------------------

def _pick_tile_m(M, bytes_per_row, *, vmem_budget_bytes=8 * 1024 * 1024,
                 max_tile=2048, min_grid_steps=2):
    """Pick a row tile that is a multiple of 8, fits a double-buffered VMEM
    budget, preferably divides M (no pad / no output slice), and leaves at
    least `min_grid_steps` grid steps (feeds both v7x TensorCores)."""
    cap = max(8, (vmem_budget_bytes // max(1, 2 * bytes_per_row)) // 8 * 8)
    target = min(max_tile, cap)
    if M >= min_grid_steps * 8:
        target = min(target, max(8, (M // min_grid_steps) // 8 * 8))
    if M <= target:
        return max(8, -(-M // 8) * 8)            # single (possibly padded) tile
    for t in range(min(target, M) // 8 * 8, 0, -8):
        if M % t == 0:
            return t                             # exact divisor -> no pad/slice
    return target                                # fall back: pad rows


# ---------------------------------------------------------------------------
# Wrapper: UpsamplingDeconvBlock forward (NDHWC activations)
# ---------------------------------------------------------------------------

def upsampling_deconv_block(x, weight, bias, *, out_dtype=jnp.bfloat16,
                            tile_m=None):
    """ConvTranspose3d(k=2, s=2, p=0) + LeakyReLU(0.1).

    x:      (B, D, H, W, Cin)       NDHWC activations (PyTorch uses NCDHW)
    weight: (Cin, Cout, 2, 2, 2)    PyTorch ConvTranspose3d weight layout
    bias:   (Cout,)
    returns (B, 2D, 2H, 2W, Cout)   in `out_dtype` (bf16 by default for HBM BW)
    """
    B, D, H, W, Cin = x.shape
    Cout = weight.shape[1]

    # ---- weight -> (Cin, kd, kh, kw, Cout) -> (Cin, 8*Cout) matmul matrix ----
    w_mat = jnp.transpose(weight, (0, 2, 3, 4, 1)).reshape(Cin, 8 * Cout)
    w_mat = w_mat.astype(jnp.bfloat16)           # tiny; cast once on host
    # bias broadcast over the 8 (kd,kh,kw) positions, co fastest-varying.
    b_vec = jnp.broadcast_to(bias.reshape(1, Cout), (8, Cout)).reshape(1, 8 * Cout)
    b_vec = b_vec.astype(jnp.float32)

    # ---- fold batch + spatial into the matmul row dimension (free reshape) ----
    M = B * D * H * W
    N = 8 * Cout
    n_pad = pl.cdiv(N, 128) * 128                # lane-dense output columns
    x_mat = x.reshape(M, Cin)                    # dtype untouched; cast in-kernel

    if tile_m is None:
        bytes_per_row = Cin * x.dtype.itemsize + n_pad * jnp.dtype(out_dtype).itemsize
        tile_m = _pick_tile_m(M, bytes_per_row)
    tile_m = max(8, (tile_m // 8) * 8)

    m_pad = pl.cdiv(M, tile_m) * tile_m
    if m_pad != M:                               # rare: tile picker prefers divisors
        x_mat = jnp.pad(x_mat, ((0, m_pad - M), (0, 0)))
    if n_pad != N:
        w_mat = jnp.pad(w_mat, ((0, 0), (0, n_pad - N)))
        b_vec = jnp.pad(b_vec, ((0, 0), (0, n_pad - N)))

    grid = (m_pad // tile_m,)
    cost = pl.CostEstimate(
        flops=2 * m_pad * Cin * n_pad,
        transcendentals=0,
        bytes_accessed=(m_pad * Cin * x_mat.dtype.itemsize
                        + Cin * n_pad * 2
                        + m_pad * n_pad * jnp.dtype(out_dtype).itemsize))

    out = pl.pallas_call(
        _deconv_matmul_kernel,
        out_shape=jax.ShapeDtypeStruct((m_pad, n_pad), out_dtype),
        grid=grid,
        in_specs=[
            pl.BlockSpec((tile_m, Cin), lambda i: (i, 0)),
            pl.BlockSpec((Cin, n_pad), lambda i: (0, 0)),
            pl.BlockSpec((1, n_pad), lambda i: (0, 0)),
        ],
        out_specs=pl.BlockSpec((tile_m, n_pad), lambda i: (i, 0)),
        compiler_params=pltpu.CompilerParams(
            dimension_semantics=("parallel",)),
        cost_estimate=cost,
    )(x_mat, w_mat, b_vec)

    if m_pad != M or n_pad != N:
        out = out[:M, :N]

    # ---- depth-to-space scatter of the 2x2x2 blocks (bf16 layout pass) ----
    out = out.reshape(B, D, H, W, 2, 2, 2, Cout)
    out = out.transpose(0, 1, 4, 2, 5, 3, 6, 7)          # (B, D,2, H,2, W,2, Cout)
    return out.reshape(B, 2 * D, 2 * H, 2 * W, Cout)


# ---------------------------------------------------------------------------
# Pure-JAX reference (same bf16 operands, f32 accumulation, bf16 output)
# ---------------------------------------------------------------------------

def reference_forward(x, weight, bias, out_dtype=jnp.bfloat16):
    B, D, H, W, Cin = x.shape
    Cout = weight.shape[1]
    xc = x.astype(jnp.bfloat16)
    wc = jnp.transpose(weight, (0, 2, 3, 4, 1)).astype(jnp.bfloat16)  # (Cin,2,2,2,Cout)
    y = jnp.einsum('bdhwc,cijko->bdhwijko', xc, wc,
                   preferred_element_type=jnp.float32)
    y = y + bias.reshape(1, 1, 1, 1, 1, 1, 1, Cout).astype(jnp.float32)
    y = jnp.maximum(y, 0.1 * y)
    y = y.transpose(0, 1, 4, 2, 5, 3, 6, 7).astype(out_dtype)
    return y.reshape(B, 2 * D, 2 * H, 2 * W, Cout)


# ---------------------------------------------------------------------------
# Main
# ---------------------------------------------------------------------------

if __name__ == "__main__":
    key = jax.random.PRNGKey(0)
    k_x, k_w, k_b = jax.random.split(key, 3)

    # Small shapes consistent with a DiffVNet decoder stage (n_filters_in=32 ->
    # n_filters_out=16, i.e. 8*Cout = 128 output lanes), spatial 8 -> 16.
    B, D, H, W = 2, 8, 8, 8
    Cin, Cout = 32, 16

    # layout: x is NDHWC (PyTorch uses NCDHW); weight keeps the PyTorch
    # ConvTranspose3d layout (Cin, Cout, kD, kH, kW).
    x = jax.random.normal(k_x, (B, D, H, W, Cin), jnp.float32)
    bound = 1.0 / math.sqrt(Cin * 8)
    weight = jax.random.uniform(k_w, (Cin, Cout, 2, 2, 2), jnp.float32,
                                -bound, bound)
    bias = jax.random.uniform(k_b, (Cout,), jnp.float32, -bound, bound)

    fwd = jax.jit(functools.partial(upsampling_deconv_block,
                                    out_dtype=jnp.bfloat16))
    out = fwd(x, weight, bias)
    out = jax.block_until_ready(out)

    # shape implied by ConvTranspose3d(k=2, s=2, p=0): spatial doubles
    assert out.shape == (B, 2 * D, 2 * H, 2 * W, Cout)
    assert out.dtype == jnp.bfloat16

    # numerical sanity vs. pure-JAX reference (same bf16 operands / bf16 output)
    ref = jax.jit(reference_forward)(x, weight, bias)
    ref = jax.block_until_ready(ref)
    out_f32 = out.astype(jnp.float32)
    ref_f32 = ref.astype(jnp.float32)
    assert bool(jnp.allclose(out_f32, ref_f32, atol=1e-2, rtol=1e-2)), \
        f"max diff {float(jnp.max(jnp.abs(out_f32 - ref_f32)))}"

    print("KERNEL_OK")
</pallas_src>

<mosaic_0001>
module attributes {stable_mosaic.version = 11 : i64} {
  func.func @_deconv_matmul_kernel(%arg0: i32, %arg1: memref<512x32xf32, #tpu.memory_space<vmem>>, %arg2: memref<32x128xbf16, #tpu.memory_space<vmem>>, %arg3: memref<1x128xf32, #tpu.memory_space<vmem>>, %arg4: memref<512x128xbf16, #tpu.memory_space<vmem>>) attributes {dimension_semantics = [#tpu.dimension_semantics<parallel>], iteration_bounds = array<i64: 2>, scalar_prefetch = 0 : i64, scratch_operands = 0 : i64, tpu.core_type = #tpu.core_type<tc>, window_params = [{transform_indices = @transform_0, window_bounds = array<i64: 512, 32>}, {pipeline_mode = #tpu.pipeline_mode<synchronous>, transform_indices = @transform_1, window_bounds = array<i64: 32, 128>}, {pipeline_mode = #tpu.pipeline_mode<synchronous>, transform_indices = @transform_2, window_bounds = array<i64: 1, 128>}, {transform_indices = @transform_3, window_bounds = array<i64: 512, 128>}]} {
    %c0 = arith.constant 0 : index
    %c0_0 = arith.constant 0 : index
    %0 = vector.load %arg1[%c0, %c0_0] : memref<512x32xf32, #tpu.memory_space<vmem>>, vector<512x32xf32>
    %1 = arith.truncf %0 : vector<512x32xf32> to vector<512x32xbf16>
    %c0_1 = arith.constant 0 : index
    %c0_2 = arith.constant 0 : index
    %2 = vector.load %arg2[%c0_1, %c0_2] : memref<32x128xbf16, #tpu.memory_space<vmem>>, vector<32x128xbf16>
    %cst = arith.constant dense<0.000000e+00> : vector<512x128xf32>
    %3 = tpu.matmul %1, %2, %cst {dimension_numbers = #tpu.dot_dimension_numbers<[1], [0], [0], [1], [0, 0, 1, 1], [], []>} : vector<512x32xbf16>, vector<32x128xbf16>, vector<512x128xf32> -> vector<512x128xf32>
    %c0_3 = arith.constant 0 : index
    %c0_4 = arith.constant 0 : index
    %4 = vector.load %arg3[%c0_3, %c0_4] : memref<1x128xf32, #tpu.memory_space<vmem>>, vector<1x128xf32>
    %5 = vector.broadcast %4 : vector<1x128xf32> to vector<512x128xf32>
    %6 = arith.addf %3, %5 : vector<512x128xf32>
    %cst_5 = arith.constant 1.000000e-01 : f32
    %7 = vector.broadcast %cst_5 : f32 to vector<512x128xf32>
    %8 = arith.mulf %7, %6 : vector<512x128xf32>
    %9 = arith.maximumf %6, %8 : vector<512x128xf32>
    %10 = arith.truncf %9 : vector<512x128xf32> to vector<512x128xbf16>
    %c0_6 = arith.constant 0 : index
    %c0_7 = arith.constant 0 : index
    %11 = vector.load %arg4[%c0_6, %c0_7] : memref<512x128xbf16, #tpu.memory_space<vmem>>, vector<512x128xbf16>
    tpu.vector_store %arg4[%c0_6, %c0_7], %10 {strides = array<i32>} : memref<512x128xbf16, #tpu.memory_space<vmem>>, vector<512x128xbf16>,
    return
  }
  func.func @transform_0(%arg0: i32) -> (i32, i32) {
    %c0_i32 = arith.constant 0 : i32
    %c0_i32_0 = arith.constant 0 : i32
    return %arg0, %c0_i32 : i32, i32
  }
  func.func @transform_1(%arg0: i32) -> (i32, i32) {
    %c0_i32 = arith.constant 0 : i32
    %c0_i32_0 = arith.constant 0 : i32
    %c0_i32_1 = arith.constant 0 : i32
    return %c0_i32, %c0_i32_0 : i32, i32
  }
  func.func @transform_2(%arg0: i32) -> (i32, i32) {
    %c0_i32 = arith.constant 0 : i32
    %c0_i32_0 = arith.constant 0 : i32
    %c0_i32_1 = arith.constant 0 : i32
    return %c0_i32, %c0_i32_0 : i32, i32
  }
  func.func @transform_3(%arg0: i32) -> (i32, i32) {
    %c0_i32 = arith.constant 0 : i32
    %c0_i32_0 = arith.constant 0 : i32
    return %arg0, %c0_i32 : i32, i32
  }
}

</mosaic_0001>

<bundles_post_ra>
// kernel: upsampling_deconv_block.1
= control target key start
LH: loop header
LB: loop body
LE: loop exit
PB: predicated region body
PF: predicated region fallthrough
CT: control target
= control target key end

     0   :  { %8 = vsyncpa [#allocation3], 0  ;;  %s2134_s0 = inlined_call_operand.hbm [shape: f32[1024,32], index: 0, kind: input, shape index: {}]   ;;  %s2135_s1 = inlined_call_operand.vmem [shape: bf16[32,128], index: 1, kind: input, shape index: {}]   ;;  %s2136_s2 = inlined_call_operand.vmem [shape: f32[1,128], index: 2, kind: input, shape index: {}]   ;;  %s2137_s3 = inlined_call_operand.vmem [shape: bf16[1024,128], index: 3, kind: output, shape index: {}]  }
   0x1   :  { %10 = vsyncpa [#allocation3 + $0x1], 0  ;;  %s1820_s12 = smov 0   ;;  %s1822_s13 = smov 0  }
   0x2   :  { %s1824_s14 = smov 0   ;;  %s1826_s15 = smov 0  }
   0x3 LB: > { %s1214_s16 = sadd.s32 4294967295, %s1795_s15   ;;  %s1840_s17 = sadd.s32 1, %s1795_s15   ;;  %s1795_s15 = sphi %s1826_s15, %s2144_s15   ;;  %s1791_s14 = sphi %s1824_s14, %s2143_s14   ;;  %s1787_s13 = sphi %s1822_s13, %s2142_s13   ;;  %s1783_s12 = sphi %s1820_s12, %s2141_s12  }
   0x4   : > { %s20_s18 = ssub.s32 %s1795_s15, %s1840_s17  ;;  %s23_s19 = sadd.s32 1, %s1791_s14 }
   0x5   : > { %p21_p0 = scmp.eq.s32.totalorder %s20_s18, 0  ;;  %p30_p1 = scmp.ne.s32.totalorder %s1791_s14, %s1787_s13 }
   0x6   : > { %p31_p2 = scmp.eq.s32.totalorder %s1795_s15, 0  ;;  %p36_p3 = scmp.ne.s32.totalorder %s1787_s13, %s1783_s12 }
   0x7   : > { %s1850_s20 = scalar_select %p21_p0, %s1791_s14, %s23_s19  }
   0x8   : > { %p32_p4 = por %p31_p2, %p30_p1  ;;  %p37_p5 = scmp.eq.s32.totalorder %s1214_s16, 0 }
   0x9   : > { %p1694_p6 = scmp.lt.s32.totalorder %s1795_s15, 2  ;;  %s134_s22 = sand.u32 1, %s1791_s14  }
   0xa   : > { %p1855_p7 = por %p37_p5, %p36_p3  ;;  %s1218_s23 = sshll.u32 %s134_s22, 9 }
   0xb   : > { %s1326_s24 = sshll.u32 %s1795_s15, 13  ;;  %s138_s28 = scalar_lea.vmem [#allocation2], %s1218_s23 }
   0xc   : > { %s1864_s27 = scalar_lea.hbm %s2134_s0, %s1326_s24  ;;  %s145_s29 = sshll.u32 %s138_s28, 4  ;;  %s1866_s29 = int_to_ptr.vmem [resolvable:$true] %s145_s29 }
   0xd   : > { %p1868_p8 = pnand %p1694_p6, %p32_p4  ;;  %s1873_s4 = scalar_lea.sflag [#allocation3], %s134_s22 }
   0xe   : > { %s1731_s5 = scalar_lea.hbm %s1864_s27, 8192  ;;  %s1736_s8 = scalar_lea.hbm %s2134_s0, 16384 }
   0xf   : > { %p1732_p10 = scmp.ne.s32.totalorder %s1864_s27, %s1731_s5  ;;  %p1733_p11 = pneg %p1868_p8 }
  0x10   : > { %p1737_p0 = scmp.lt.u32.totalorder %s1864_s27, %s2134_s0  ;;  %p1738_p1 = scmp.lt.u32.totalorder %s1736_s8, %s1731_s5 }
  0x11   : > { %p1734_p12 = pnand %p1733_p11, %p1732_p10  ;;  %p1740_p3 = scmp.lt.u32.totalorder %s1731_s5, %s1864_s27 }
  0x12   : > { %p1739_p2 = por %p1738_p1, %p1737_p0 }
  0x13   : > { %p1735_p13 = pneg %p1734_p12 }
  0x14   : > { %p1741_p4 = por %p1740_p3, %p1739_p2 }
  0x16   : > { %p1742_p5 = pnand %p1741_p4, %p1735_p13 }
  0x18   : > { %1745 = shalt.err (!%p1742_p5)
}
  0x19   : > { %s1746_s11 = scalar_lea.vmem %s1866_s29, 8192  ;;  %s1797_s12 = smov [#allocation2]  }
  0x1a   : > { %p1747_p6 = scmp.ne.s32.totalorder %s1866_s29, %s1746_s11  ;;  %s1751_s18 = sshll.u32 %s1797_s12, 4  ;;  %s1752_s18 = int_to_ptr.vmem [resolvable:$false] %s1751_s18 }
  0x1b   : > { %s1753_s19 = scalar_lea.vmem %s1752_s18, 16384  ;;  %p1754_p9 = scmp.lt.s32.totalorder %s1866_s29, %s1752_s18 }
  0x1c   : > { %p1749_p10 = pnand %p1747_p6, %p1733_p11  ;;  %p1755_p0 = scmp.lt.s32.totalorder %s1753_s19, %s1746_s11 }
  0x1e   : > { %p1750_p12 = pneg %p1749_p10  ;;  %p1756_p1 = por %p1755_p0, %p1754_p9 }
  0x20   : > { %p1757_p2 = pnand %p1756_p1, %p1750_p12 }
  0x22   : > { %1760 = shalt.err (!%p1757_p2)
}
  0x23   : > { %s1798_s22 = smov 128   ;;  %s1799_s23 = smov 8  }
  0x24   : > { %1693 = dma.hbm_to_vmem [thread:$0]  (!%p1868_p8), %s1864_s27, 8192, %s1866_s29, %s1873_s4, %s1798_s22, %s1798_s22, %s1799_s23  }
  0x25   : > { %p153_p11 = scmp.lt.s32.totalorder %s1795_s15, 3  ;;  %p2140_p13 = scmp.ge.s32.totalorder %s1795_s15, 1 }
  0x27   : > { %p154_p3 = pnand %p2140_p13, %p153_p11 }
  0x28   : > { %s159_s24 = sand.u32 (!%p154_p3), 1, %s1787_s13  }
  0x29   : > { %157 = sbr.rel (%p154_p3) target bundleno = 339 (0x153), region = 32  ;;  %s1222_s25 = sshll.u32 (!%p154_p3), %s159_s24, 9 }
  0x2a   : > { %s160_s26 = scalar_lea.sflag (!%p154_p3), [#allocation3], %s159_s24  ;;  %s1905_s28 = scalar_lea.vmem (!%p154_p3), [#allocation2], %s1222_s25 }
  0x30   : > { %1778 = dma.done.wait (%p1855_p7), %s160_s26, 8192  }
  0x31   : > { %1780 = vsyncadd (%p1855_p7), %s160_s26, 4294959104  ;;  %v1729_v0 = vld [vmem:[%s2135_s1] sm:$0xff]   ;;  %v1730_v1 = vld [vmem:[%s2135_s1 + $0x8] sm:$0xff]   ;;  %vm313_vm0 = vcmask 261120   ;;  %s1223_s21 = sshll.u32 %s1214_s16, 6 }
  0x32   : > { %1616 = vmatprep.subr.bf16.mxu0 %v1729_v0  ;;  %1684 = vmatprep.subr.bf16.mxu1 %v1729_v0  ;;  %v194_v2 = vld [vmem:[%s1905_s28] sm:$0xff]  ;;  %v195_v3 = vld [vmem:[%s1905_s28 + $0x8] sm:$0xff]  ;;  %v196_v7 = vld [vmem:[%s1905_s28 + $0x10] sm:$0xff]  ;;  %p188_p7 = scmp.lt.s32.totalorder %s1223_s21, 127 }
  0x33   : > { %v226_v4 = vld [vmem:[%s1905_s28 + $0x100] sm:$0xff]  ;;  %1617 = vmatpush3.bf16.msra.mxu0 %v1729_v0  ;;  %1686 = vmatpush3.bf16.msra.mxu1 %v1729_v0  ;;  %v258_v5 = vpack.c.bf16 %v195_v3, %v194_v2  ;;  %v227_v6 = vld [vmem:[%s1905_s28 + $0x108] sm:$0xff]  ;;  %v197_v8 = vld [vmem:[%s1905_s28 + $0x18] sm:$0xff] }
  0x34   : > { %1618 = vmatprep.subr.bf16.mxu0 %v1730_v1  ;;  %1685 = vmatprep.subr.bf16.mxu1 %v1730_v1  ;;  %v274_v9 = vpack.c.bf16 %v227_v6, %v226_v4  ;;  %v228_v10 = vld [vmem:[%s1905_s28 + $0x110] sm:$0xff]  ;;  %v229_v11 = vld [vmem:[%s1905_s28 + $0x118] sm:$0xff]  ;;  %v198_v12 = vld [vmem:[%s1905_s28 + $0x20] sm:$0xff]  ;;  %v259_v16 = vpack.c.bf16 %v197_v8, %v196_v7  ;;  %s2146_s21 = smov (!%p188_p7, %s1223_s21), 127 }
  0x35   : > { %1620 = vmatprep.mubr.msk.bf16.mxu0 %vm313_vm0, %v258_v5  ;;  %v199_v13 = vld [vmem:[%s1905_s28 + $0x28] sm:$0xff]  ;;  %v230_v14 = vld [vmem:[%s1905_s28 + $0x120] sm:$0xff]  ;;  %v275_v17 = vpack.c.bf16 %v229_v11, %v228_v10  ;;  %v200_v20 = vld [vmem:[%s1905_s28 + $0x30] sm:$0xff]  ;;  %s1224_s15 = sshll.u32 %s2146_s21, 2 }
  0x36   : > { %v231_v15 = vld [vmem:[%s1905_s28 + $0x128] sm:$0xff]  ;;  %1652 = vmatprep.mubr.msk.bf16.mxu1 %vm313_vm0, %v274_v9  ;;  %v260_v18 = vpack.c.bf16 %v199_v13, %v198_v12  ;;  %v201_v21 = vld [vmem:[%s1905_s28 + $0x38] sm:$0xff]  ;;  %v232_v22 = vld [vmem:[%s1905_s28 + $0x130] sm:$0xff]  ;;  %s2031_s8 = scalar_lea.vmem %s2137_s3, %s1224_s15 }
  0x37   : > { %1619 = vmatpush3.bf16.msra.mxu0 %v1730_v1  ;;  %1687 = vmatpush3.bf16.msra.mxu1 %v1730_v1  ;;  %v276_v19 = vpack.c.bf16 %v231_v15, %v230_v14  ;;  %v233_v23 = vld [vmem:[%s1905_s28 + $0x138] sm:$0xff]  ;;  %v202_v24 = vld [vmem:[%s1905_s28 + $0x40] sm:$0xff]  ;;  %v203_v25 = vld [vmem:[%s1905_s28 + $0x48] sm:$0xff]  ;;  %v261_v28 = vpack.c.bf16 %v201_v21, %v200_v20 }
  0x38   : > { %v234_v26 = vld [vmem:[%s1905_s28 + $0x140] sm:$0xff]  ;;  %v235_v27 = vld [vmem:[%s1905_s28 + $0x148] sm:$0xff]  ;;  %v277_v29 = vpack.c.bf16 %v233_v23, %v232_v22  ;;  %v262_v30 = vpack.c.bf16 %v203_v25, %v202_v24  ;;  %v204_v32 = vld [vmem:[%s1905_s28 + $0x50] sm:$0xff] }
  0x39   : > { %v278_v31 = vpack.c.bf16 %v235_v27, %v234_v26  ;;  %v205_v33 = vld [vmem:[%s1905_s28 + $0x58] sm:$0xff]  ;;  %v236_v34 = vld [vmem:[%s1905_s28 + $0x150] sm:$0xff]  ;;  %v206_v36 = vld [vmem:[%s1905_s28 + $0x60] sm:$0xff] }
  0x3a   : > { %1621 = vmatmul.mubr.msk.bf16.vlgmr.msra.gmra.mrb[0].mxu0 %vm313_vm0, %v259_v16  ;;  %1653 = vmatmul.mubr.msk.bf16.vlgmr.msra.gmra.mrb[0].mxu1 %vm313_vm0, %v275_v17  ;;  %v237_v35 = vld [vmem:[%s1905_s28 + $0x158] sm:$0xff]  ;;  %v207_v37 = vld [vmem:[%s1905_s28 + $0x68] sm:$0xff]  ;;  %v238_v38 = vld [vmem:[%s1905_s28 + $0x160] sm:$0xff]  ;;  %v263_v40 = vpack.c.bf16 %v205_v33, %v204_v32 }
  0x3b   : > { %1624 = vmatprep.mubr.msk.bf16.mxu0 %vm313_vm0, %v260_v18  ;;  %1656 = vmatprep.mubr.msk.bf16.mxu1 %vm313_vm0, %v276_v19  ;;  %v239_v39 = vld [vmem:[%s1905_s28 + $0x168] sm:$0xff]  ;;  %v279_v41 = vpack.c.bf16 %v237_v35, %v236_v34  ;;  %v264_v42 = vpack.c.bf16 %v207_v37, %v206_v36  ;;  %v208_v44 = vld [vmem:[%s1905_s28 + $0x70] sm:$0xff]  ;;  %v209_v45 = vld [vmem:[%s1905_s28 + $0x78] sm:$0xff] }
  0x3c   : > { %v280_v43 = vpack.c.bf16 %v239_v39, %v238_v38  ;;  %v240_v46 = vld [vmem:[%s1905_s28 + $0x170] sm:$0xff]  ;;  %v241_v47 = vld [vmem:[%s1905_s28 + $0x178] sm:$0xff]  ;;  %v210_v48 = vld [vmem:[%s1905_s28 + $0x80] sm:$0xff]  ;;  %v265_v52 = vpack.c.bf16 %v209_v45, %v208_v44 }
  0x3d   : > { %v211_v49 = vld [vmem:[%s1905_s28 + $0x88] sm:$0xff]  ;;  %v242_v50 = vld [vmem:[%s1905_s28 + $0x180] sm:$0xff]  ;;  %v281_v53 = vpack.c.bf16 %v241_v47, %v240_v46  ;;  %v212_v56 = vld [vmem:[%s1905_s28 + $0x90] sm:$0xff] }
  0x3e   : > { %v243_v51 = vld [vmem:[%s1905_s28 + $0x188] sm:$0xff]  ;;  %v266_v54 = vpack.c.bf16 %v211_v49, %v210_v48  ;;  %v213_v57 = vld [vmem:[%s1905_s28 + $0x98] sm:$0xff]  ;;  %v244_v58 = vld [vmem:[%s1905_s28 + $0x190] sm:$0xff] }
  0x3f   : > { %v282_v55 = vpack.c.bf16 %v243_v51, %v242_v50  ;;  %v245_v59 = vld [vmem:[%s1905_s28 + $0x198] sm:$0xff]  ;;  %v214_v60 = vld [vmem:[%s1905_s28 + $0xa0] sm:$0xff]  ;;  %v215_v61 = vld [vmem:[%s1905_s28 + $0xa8] sm:$0xff]  ;;  %v267_v0 = vpack.c.bf16 %v213_v57, %v212_v56 }
  0x40   : > { %v246_v62 = vld [vmem:[%s1905_s28 + $0x1a0] sm:$0xff]  ;;  %v247_v63 = vld [vmem:[%s1905_s28 + $0x1a8] sm:$0xff]  ;;  %v283_v1 = vpack.c.bf16 %v245_v59, %v244_v58  ;;  %v268_v2 = vpack.c.bf16 %v215_v61, %v214_v60  ;;  %v216_v4 = vld [vmem:[%s1905_s28 + $0xb0] sm:$0xff] }
  0x41   : > { %v284_v3 = vpack.c.bf16 %v247_v63, %v246_v62  ;;  %v217_v5 = vld [vmem:[%s1905_s28 + $0xb8] sm:$0xff]  ;;  %v248_v6 = vld [vmem:[%s1905_s28 + $0x1b0] sm:$0xff]  ;;  %v218_v8 = vld [vmem:[%s1905_s28 + $0xc0] sm:$0xff] }
  0x42   : > { %1625 = vmatmul.mubr.msk.bf16.gmra.mrb[4].mxu0 %vm313_vm0, %v261_v28  ;;  %1657 = vmatmul.mubr.msk.bf16.gmra.mrb[4].mxu1 %vm313_vm0, %v277_v29  ;;  %v249_v7 = vld [vmem:[%s1905_s28 + $0x1b8] sm:$0xff]  ;;  %v219_v9 = vld [vmem:[%s1905_s28 + $0xc8] sm:$0xff]  ;;  %v250_v10 = vld [vmem:[%s1905_s28 + $0x1c0] sm:$0xff]  ;;  %v269_v12 = vpack.c.bf16 %v217_v5, %v216_v4 }
  0x43   : > { %1628 = vmatprep.mubr.msk.bf16.mxu0 %vm313_vm0, %v262_v30  ;;  %1660 = vmatprep.mubr.msk.bf16.mxu1 %vm313_vm0, %v278_v31  ;;  %v251_v11 = vld [vmem:[%s1905_s28 + $0x1c8] sm:$0xff]  ;;  %v285_v13 = vpack.c.bf16 %v249_v7, %v248_v6  ;;  %v270_v14 = vpack.c.bf16 %v219_v9, %v218_v8  ;;  %v220_v16 = vld [vmem:[%s1905_s28 + $0xd0] sm:$0xff]  ;;  %v221_v17 = vld [vmem:[%s1905_s28 + $0xd8] sm:$0xff] }
  0x44   : > { %v286_v15 = vpack.c.bf16 %v251_v11, %v250_v10  ;;  %v252_v18 = vld [vmem:[%s1905_s28 + $0x1d0] sm:$0xff]  ;;  %v253_v19 = vld [vmem:[%s1905_s28 + $0x1d8] sm:$0xff]  ;;  %v222_v20 = vld [vmem:[%s1905_s28 + $0xe0] sm:$0xff]  ;;  %v271_v24 = vpack.c.bf16 %v221_v17, %v220_v16 }
  0x45   : > { %v223_v21 = vld [vmem:[%s1905_s28 + $0xe8] sm:$0xff]  ;;  %v254_v22 = vld [vmem:[%s1905_s28 + $0x1e0] sm:$0xff]  ;;  %v287_v25 = vpack.c.bf16 %v253_v19, %v252_v18  ;;  %v224_v28 = vld [vmem:[%s1905_s28 + $0xf0] sm:$0xff] }
  0x46   : > { %v255_v23 = vld [vmem:[%s1905_s28 + $0x1e8] sm:$0xff]  ;;  %v272_v26 = vpack.c.bf16 %v223_v21, %v222_v20  ;;  %v225_v29 = vld [vmem:[%s1905_s28 + $0xf8] sm:$0xff]  ;;  %v256_v30 = vld [vmem:[%s1905_s28 + $0x1f0] sm:$0xff] }
  0x47   : > { %v288_v27 = vpack.c.bf16 %v255_v23, %v254_v22  ;;  %v257_v31 = vld [vmem:[%s1905_s28 + $0x1f8] sm:$0xff]  ;;  %v273_v32 = vpack.c.bf16 %v225_v29, %v224_v28  ;;  %v2018_v34 = vld [vmem:[%s2136_s2] ss:$0 sm:$0xff] }
  0x48   : > { %v289_v33 = vpack.c.bf16 %v257_v31, %v256_v30 }
  0x4a   : > { %1629 = vmatmul.mubr.msk.bf16.gmra.mrb[8].mxu0 %vm313_vm0, %v263_v40  ;;  %1661 = vmatmul.mubr.msk.bf16.gmra.mrb[8].mxu1 %vm313_vm0, %v279_v41 }
  0x4b   : > { %1632 = vmatprep.mubr.msk.bf16.mxu0 %vm313_vm0, %v264_v42  ;;  %1664 = vmatprep.mubr.msk.bf16.mxu1 %vm313_vm0, %v280_v43 }
  0x52   : > { %1633 = vmatmul.mubr.msk.bf16.gmra.mrb[12].mxu0 %vm313_vm0, %v265_v52  ;;  %1665 = vmatmul.mubr.msk.bf16.gmra.mrb[12].mxu1 %vm313_vm0, %v281_v53 }
  0x53   : > { %1636 = vmatprep.mubr.msk.bf16.mxu0 %vm313_vm0, %v266_v54  ;;  %1668 = vmatprep.mubr.msk.bf16.mxu1 %vm313_vm0, %v282_v55 }
  0x5a   : > { %1637 = vmatmul.mubr.msk.bf16.gmra.mrb[16].mxu0 %vm313_vm0, %v267_v0  ;;  %1669 = vmatmul.mubr.msk.bf16.gmra.mrb[16].mxu1 %vm313_vm0, %v283_v1 }
  0x5b   : > { %1640 = vmatprep.mubr.msk.bf16.mxu0 %vm313_vm0, %v268_v2  ;;  %1672 = vmatprep.mubr.msk.bf16.mxu1 %vm313_vm0, %v284_v3 }
  0x62   : > { %1641 = vmatmul.mubr.msk.bf16.gmra.mrb[20].mxu0 %vm313_vm0, %v269_v12  ;;  %1673 = vmatmul.mubr.msk.bf16.gmra.mrb[20].mxu1 %vm313_vm0, %v285_v13 }
  0x63   : > { %1644 = vmatprep.mubr.msk.bf16.mxu0 %vm313_vm0, %v270_v14  ;;  %1676 = vmatprep.mubr.msk.bf16.mxu1 %vm313_vm0, %v286_v15 }
  0x6a   : > { %1645 = vmatmul.mubr.msk.bf16.gmra.mrb[24].mxu0 %vm313_vm0, %v271_v24  ;;  %1677 = vmatmul.mubr.msk.bf16.gmra.mrb[24].mxu1 %vm313_vm0, %v287_v25 }
  0x6b   : > { %1648 = vmatprep.mubr.msk.bf16.mxu0 %vm313_vm0, %v272_v26  ;;  %1680 = vmatprep.mubr.msk.bf16.mxu1 %vm313_vm0, %v288_v27 }
  0x72   : > { %1649 = vmatmul.mubr.msk.bf16.gmra.mrb[28].mxu0 %vm313_vm0, %v273_v32  ;;  %1681 = vmatmul.mubr.msk.bf16.gmra.mrb[28].mxu1 %vm313_vm0, %v289_v33 }
 0x10d   : > { %v1622_v35 = vpop.f32.mrb[0].mxu0  ;;  %v1654_v36 = vpop.f32.mrb[0].mxu1 }
 0x10e   : > { %v453_v37 = vadd.f32 %v1622_v35, %v2018_v34  ;;  %v581_v38 = vadd.f32 %v1654_v36, %v2018_v34  ;;  %v444_v39 = vpop.f32.mrb[1].mxu0  ;;  %v572_v40 = vpop.f32.mrb[1].mxu1 }
 0x10f   : > { %v445_v41 = vadd.f32 %v2018_v34, %v444_v39  ;;  %v573_v42 = vadd.f32 %v2018_v34, %v572_v40  ;;  %v1623_v43 = vpop.f32.mrb[2].mxu0  ;;  %v1655_v44 = vpop.f32.mrb[2].mxu1 }
 0x110   : > { %v701_v45 = vmul.f32 0.1, %v453_v37  ;;  %v733_v46 = vmul.f32 0.1, %v581_v38  ;;  %v456_v47 = vadd.f32 %v1623_v43, %v2018_v34  ;;  %v584_v48 = vadd.f32 %v1655_v44, %v2018_v34  ;;  %v447_v49 = vpop.f32.mrb[3].mxu0  ;;  %v575_v50 = vpop.f32.mrb[3].mxu1 }
 0x111   : > { %v699_v51 = vmul.f32 0.1, %v445_v41  ;;  %v731_v52 = vmul.f32 0.1, %v573_v42  ;;  %v448_v53 = vadd.f32 %v2018_v34, %v447_v49  ;;  %v576_v54 = vadd.f32 %v2018_v34, %v575_v50 }
 0x112   : > { %v702_v55 = vmul.f32 0.1, %v456_v47  ;;  %v734_v56 = vmul.f32 0.1, %v584_v48  ;;  %v765_v59 = vmax.f32 %v453_v37, %v701_v45  ;;  %v797_v60 = vmax.f32 %v581_v38, %v733_v46 }
 0x113   : > { %v700_v57 = vmul.f32 0.1, %v448_v53  ;;  %v732_v58 = vmul.f32 0.1, %v576_v54  ;;  %v763_v63 = vmax.f32 %v445_v41, %v699_v51  ;;  %v795_v0 = vmax.f32 %v573_v42, %v731_v52 }
 0x114   : > { %v766_v61 = vmax.f32 %v456_v47, %v702_v55  ;;  %v798_v62 = vmax.f32 %v584_v48, %v734_v56 }
 0x115   : > { %v764_v1 = vmax.f32 %v448_v53, %v700_v57  ;;  %v796_v2 = vmax.f32 %v576_v54, %v732_v58  ;;  %v1626_v3 = vpop.f32.mrb[4].mxu0  ;;  %v1658_v4 = vpop.f32.mrb[4].mxu1 }
 0x116   : > { %v1399_v5 = vpack.c.bf16 %v766_v61, %v765_v59  ;;  %v1479_v6 = vpack.c.bf16 %v798_v62, %v797_v60  ;;  %v469_v7 = vadd.f32 %v1626_v3, %v2018_v34  ;;  %v597_v8 = vadd.f32 %v1658_v4, %v2018_v34  ;;  %v460_v9 = vpop.f32.mrb[5].mxu0  ;;  %v588_v10 = vpop.f32.mrb[5].mxu1 }
 0x117   : > { %v1394_v11 = vpack.c.bf16 %v764_v1, %v763_v63  ;;  %v1474_v12 = vpack.c.bf16 %v796_v2, %v795_v0  ;;  %v461_v13 = vadd.f32 %v2018_v34, %v460_v9  ;;  %v589_v14 = vadd.f32 %v2018_v34, %v588_v10  ;;  %v1627_v15 = vpop.f32.mrb[6].mxu0  ;;  %v1659_v16 = vpop.f32.mrb[6].mxu1 }
 0x118   : > { %1551 = vst [vmem:[%s2031_s8 + $0x8] sm:$0xff] %v1399_v5   ;;  %1567 = vst [vmem:[%s2031_s8 + $0x88] sm:$0xff] %v1479_v6   ;;  %v705_v17 = vmul.f32 0.1, %v469_v7  ;;  %v737_v18 = vmul.f32 0.1, %v597_v8  ;;  %v472_v19 = vadd.f32 %v1627_v15, %v2018_v34  ;;  %v600_v20 = vadd.f32 %v1659_v16, %v2018_v34 }
 0x119   : > { %v463_v21 = vpop.f32.mrb[7].mxu0  ;;  %v591_v22 = vpop.f32.mrb[7].mxu1  ;;  %1395 = vst [vmem:[%s2031_s8] sm:$0xff] %v1394_v11   ;;  %1566 = vst [vmem:[%s2031_s8 + $0x80] sm:$0xff] %v1474_v12   ;;  %v703_v23 = vmul.f32 0.1, %v461_v13 }
 0x11a   : > { %v735_v24 = vmul.f32 0.1, %v589_v14  ;;  %v464_v25 = vadd.f32 %v2018_v34, %v463_v21  ;;  %v592_v26 = vadd.f32 %v2018_v34, %v591_v22  ;;  %v706_v27 = vmul.f32 0.1, %v472_v19 }
 0x11b   : > { %v738_v28 = vmul.f32 0.1, %v600_v20  ;;  %v769_v31 = vmax.f32 %v469_v7, %v705_v17  ;;  %v801_v32 = vmax.f32 %v597_v8, %v737_v18  ;;  %v767_v36 = vmax.f32 %v461_v13, %v703_v23 }
 0x11c   : > { %v704_v29 = vmul.f32 0.1, %v464_v25  ;;  %v736_v30 = vmul.f32 0.1, %v592_v26  ;;  %v770_v33 = vmax.f32 %v472_v19, %v706_v27  ;;  %v799_v37 = vmax.f32 %v589_v14, %v735_v24 }
 0x11d   : > { %v802_v35 = vmax.f32 %v600_v20, %v738_v28  ;;  %v1630_v40 = vpop.f32.mrb[8].mxu0  ;;  %v1662_v41 = vpop.f32.mrb[8].mxu1 }
 0x11e   : > { %v768_v38 = vmax.f32 %v464_v25, %v704_v29  ;;  %v800_v39 = vmax.f32 %v592_v26, %v736_v30  ;;  %v1409_v42 = vpack.c.bf16 %v770_v33, %v769_v31  ;;  %v485_v44 = vadd.f32 %v1630_v40, %v2018_v34  ;;  %v476_v46 = vpop.f32.mrb[9].mxu0  ;;  %v604_v47 = vpop.f32.mrb[9].mxu1 }
 0x11f   : > { %v1489_v43 = vpack.c.bf16 %v802_v35, %v801_v32  ;;  %v613_v45 = vadd.f32 %v1662_v41, %v2018_v34  ;;  %v477_v50 = vadd.f32 %v2018_v34, %v476_v46  ;;  %v605_v51 = vadd.f32 %v2018_v34, %v604_v47  ;;  %v1631_v52 = vpop.f32.mrb[10].mxu0  ;;  %v1663_v53 = vpop.f32.mrb[10].mxu1 }
 0x120   : > { %v1404_v48 = vpack.c.bf16 %v768_v38, %v767_v36  ;;  %v1484_v49 = vpack.c.bf16 %v800_v39, %v799_v37  ;;  %1553 = vst [vmem:[%s2031_s8 + $0x18] sm:$0xff] %v1409_v42   ;;  %v709_v54 = vmul.f32 0.1, %v485_v44  ;;  %v488_v56 = vadd.f32 %v1631_v52, %v2018_v34  ;;  %v479_v58 = vpop.f32.mrb[11].mxu0  ;;  %v607_v59 = vpop.f32.mrb[11].mxu1 }
 0x121   : > { %1569 = vst [vmem:[%s2031_s8 + $0x98] sm:$0xff] %v1489_v43   ;;  %v741_v55 = vmul.f32 0.1, %v613_v45  ;;  %v616_v57 = vadd.f32 %v1663_v53, %v2018_v34  ;;  %v707_v60 = vmul.f32 0.1, %v477_v50  ;;  %v480_v62 = vadd.f32 %v2018_v34, %v479_v58 }
 0x122   : > { %1552 = vst [vmem:[%s2031_s8 + $0x10] sm:$0xff] %v1404_v48   ;;  %1568 = vst [vmem:[%s2031_s8 + $0x90] sm:$0xff] %v1484_v49   ;;  %v739_v61 = vmul.f32 0.1, %v605_v51  ;;  %v608_v63 = vadd.f32 %v2018_v34, %v607_v59  ;;  %v710_v0 = vmul.f32 0.1, %v488_v56  ;;  %v773_v4 = vmax.f32 %v485_v44, %v709_v54 }
 0x123   : > { %v742_v1 = vmul.f32 0.1, %v616_v57  ;;  %v708_v2 = vmul.f32 0.1, %v480_v62  ;;  %v805_v5 = vmax.f32 %v613_v45, %v741_v55  ;;  %v771_v8 = vmax.f32 %v477_v50, %v707_v60 }
 0x124   : > { %v740_v3 = vmul.f32 0.1, %v608_v63  ;;  %v774_v6 = vmax.f32 %v488_v56, %v710_v0  ;;  %v803_v9 = vmax.f32 %v605_v51, %v739_v61 }
 0x125   : > { %v806_v7 = vmax.f32 %v616_v57, %v742_v1  ;;  %v772_v10 = vmax.f32 %v480_v62, %v708_v2  ;;  %v1634_v12 = vpop.f32.mrb[12].mxu0  ;;  %v1666_v13 = vpop.f32.mrb[12].mxu1 }
 0x126   : > { %v804_v11 = vmax.f32 %v608_v63, %v740_v3  ;;  %v1419_v14 = vpack.c.bf16 %v774_v6, %v773_v4  ;;  %v501_v16 = vadd.f32 %v1634_v12, %v2018_v34  ;;  %v629_v17 = vadd.f32 %v1666_v13, %v2018_v34  ;;  %v492_v18 = vpop.f32.mrb[13].mxu0  ;;  %v620_v19 = vpop.f32.mrb[13].mxu1 }
 0x127   : > { %v1499_v15 = vpack.c.bf16 %v806_v7, %v805_v5  ;;  %v1414_v20 = vpack.c.bf16 %v772_v10, %v771_v8  ;;  %v493_v22 = vadd.f32 %v2018_v34, %v492_v18  ;;  %v621_v23 = vadd.f32 %v2018_v34, %v620_v19  ;;  %v1635_v24 = vpop.f32.mrb[14].mxu0  ;;  %v1667_v25 = vpop.f32.mrb[14].mxu1 }
 0x128   : > { %v1494_v21 = vpack.c.bf16 %v804_v11, %v803_v9  ;;  %1555 = vst [vmem:[%s2031_s8 + $0x28] sm:$0xff] %v1419_v14   ;;  %v713_v26 = vmul.f32 0.1, %v501_v16  ;;  %v745_v27 = vmul.f32 0.1, %v629_v17  ;;  %v504_v28 = vadd.f32 %v1635_v24, %v2018_v34  ;;  %v495_v30 = vpop.f32.mrb[15].mxu0 }
 0x129   : > { %1571 = vst [vmem:[%s2031_s8 + $0xa8] sm:$0xff] %v1499_v15   ;;  %v632_v29 = vadd.f32 %v1667_v25, %v2018_v34  ;;  %v623_v31 = vpop.f32.mrb[15].mxu1  ;;  %1554 = vst [vmem:[%s2031_s8 + $0x20] sm:$0xff] %v1414_v20   ;;  %v711_v32 = vmul.f32 0.1, %v493_v22  ;;  %v496_v35 = vadd.f32 %v2018_v34, %v495_v30 }
 0x12a   : > { %1570 = vst [vmem:[%s2031_s8 + $0xa0] sm:$0xff] %v1494_v21   ;;  %v743_v33 = vmul.f32 0.1, %v621_v23  ;;  %v624_v36 = vadd.f32 %v2018_v34, %v623_v31  ;;  %v714_v37 = vmul.f32 0.1, %v504_v28  ;;  %v777_v41 = vmax.f32 %v501_v16, %v713_v26 }
 0x12b   : > { %v746_v38 = vmul.f32 0.1, %v632_v29  ;;  %v712_v39 = vmul.f32 0.1, %v496_v35  ;;  %v809_v42 = vmax.f32 %v629_v17, %v745_v27  ;;  %v775_v45 = vmax.f32 %v493_v22, %v711_v32 }
 0x12c   : > { %v744_v40 = vmul.f32 0.1, %v624_v36  ;;  %v778_v43 = vmax.f32 %v504_v28, %v714_v37  ;;  %v807_v46 = vmax.f32 %v621_v23, %v743_v33 }
 0x12d   : > { %v810_v44 = vmax.f32 %v632_v29, %v746_v38  ;;  %v776_v47 = vmax.f32 %v496_v35, %v712_v39  ;;  %v1638_v49 = vpop.f32.mrb[16].mxu0  ;;  %v1670_v50 = vpop.f32.mrb[16].mxu1 }
 0x12e   : > { %v808_v48 = vmax.f32 %v624_v36, %v744_v40  ;;  %v1429_v51 = vpack.c.bf16 %v778_v43, %v777_v41  ;;  %v517_v53 = vadd.f32 %v1638_v49, %v2018_v34  ;;  %v645_v54 = vadd.f32 %v1670_v50, %v2018_v34  ;;  %v508_v55 = vpop.f32.mrb[17].mxu0  ;;  %v636_v56 = vpop.f32.mrb[17].mxu1 }
 0x12f   : > { %v1509_v52 = vpack.c.bf16 %v810_v44, %v809_v42  ;;  %v1424_v57 = vpack.c.bf16 %v776_v47, %v775_v45  ;;  %v509_v59 = vadd.f32 %v2018_v34, %v508_v55  ;;  %v637_v60 = vadd.f32 %v2018_v34, %v636_v56  ;;  %v1639_v61 = vpop.f32.mrb[18].mxu0  ;;  %v1671_v62 = vpop.f32.mrb[18].mxu1 }
 0x130   : > { %v1504_v58 = vpack.c.bf16 %v808_v48, %v807_v46  ;;  %1557 = vst [vmem:[%s2031_s8 + $0x38] sm:$0xff] %v1429_v51   ;;  %v717_v63 = vmul.f32 0.1, %v517_v53  ;;  %v749_v0 = vmul.f32 0.1, %v645_v54  ;;  %v520_v1 = vadd.f32 %v1639_v61, %v2018_v34  ;;  %v511_v3 = vpop.f32.mrb[19].mxu0 }
 0x131   : > { %1573 = vst [vmem:[%s2031_s8 + $0xb8] sm:$0xff] %v1509_v52   ;;  %v648_v2 = vadd.f32 %v1671_v62, %v2018_v34  ;;  %v639_v4 = vpop.f32.mrb[19].mxu1  ;;  %1556 = vst [vmem:[%s2031_s8 + $0x30] sm:$0xff] %v1424_v57   ;;  %v715_v5 = vmul.f32 0.1, %v509_v59  ;;  %v512_v7 = vadd.f32 %v2018_v34, %v511_v3 }
 0x132   : > { %1572 = vst [vmem:[%s2031_s8 + $0xb0] sm:$0xff] %v1504_v58   ;;  %v747_v6 = vmul.f32 0.1, %v637_v60  ;;  %v640_v8 = vadd.f32 %v2018_v34, %v639_v4  ;;  %v718_v9 = vmul.f32 0.1, %v520_v1  ;;  %v781_v13 = vmax.f32 %v517_v53, %v717_v63 }
 0x133   : > { %v750_v10 = vmul.f32 0.1, %v648_v2  ;;  %v716_v11 = vmul.f32 0.1, %v512_v7  ;;  %v813_v14 = vmax.f32 %v645_v54, %v749_v0  ;;  %v779_v17 = vmax.f32 %v509_v59, %v715_v5 }
 0x134   : > { %v748_v12 = vmul.f32 0.1, %v640_v8  ;;  %v782_v15 = vmax.f32 %v520_v1, %v718_v9  ;;  %v811_v18 = vmax.f32 %v637_v60, %v747_v6 }
 0x135   : > { %v814_v16 = vmax.f32 %v648_v2, %v750_v10  ;;  %v780_v19 = vmax.f32 %v512_v7, %v716_v11  ;;  %v1642_v21 = vpop.f32.mrb[20].mxu0  ;;  %v1674_v22 = vpop.f32.mrb[20].mxu1 }
 0x136   : > { %v812_v20 = vmax.f32 %v640_v8, %v748_v12  ;;  %v1439_v23 = vpack.c.bf16 %v782_v15, %v781_v13  ;;  %v533_v25 = vadd.f32 %v1642_v21, %v2018_v34  ;;  %v661_v26 = vadd.f32 %v1674_v22, %v2018_v34  ;;  %v524_v27 = vpop.f32.mrb[21].mxu0  ;;  %v652_v28 = vpop.f32.mrb[21].mxu1 }
 0x137   : > { %v1519_v24 = vpack.c.bf16 %v814_v16, %v813_v14  ;;  %v1434_v29 = vpack.c.bf16 %v780_v19, %v779_v17  ;;  %v525_v31 = vadd.f32 %v2018_v34, %v524_v27  ;;  %v653_v32 = vadd.f32 %v2018_v34, %v652_v28  ;;  %v1643_v33 = vpop.f32.mrb[22].mxu0  ;;  %v1675_v35 = vpop.f32.mrb[22].mxu1 }
 0x138   : > { %v1514_v30 = vpack.c.bf16 %v812_v20, %v811_v18  ;;  %1559 = vst [vmem:[%s2031_s8 + $0x48] sm:$0xff] %v1439_v23   ;;  %v721_v36 = vmul.f32 0.1, %v533_v25  ;;  %v753_v37 = vmul.f32 0.1, %v661_v26  ;;  %v536_v38 = vadd.f32 %v1643_v33, %v2018_v34  ;;  %v527_v40 = vpop.f32.mrb[23].mxu0 }
 0x139   : > { %1575 = vst [vmem:[%s2031_s8 + $0xc8] sm:$0xff] %v1519_v24   ;;  %v664_v39 = vadd.f32 %v1675_v35, %v2018_v34  ;;  %v655_v41 = vpop.f32.mrb[23].mxu1  ;;  %1558 = vst [vmem:[%s2031_s8 + $0x40] sm:$0xff] %v1434_v29   ;;  %v719_v42 = vmul.f32 0.1, %v525_v31  ;;  %v528_v44 = vadd.f32 %v2018_v34, %v527_v40 }
 0x13a   : > { %1574 = vst [vmem:[%s2031_s8 + $0xc0] sm:$0xff] %v1514_v30   ;;  %v751_v43 = vmul.f32 0.1, %v653_v32  ;;  %v656_v45 = vadd.f32 %v2018_v34, %v655_v41  ;;  %v722_v46 = vmul.f32 0.1, %v536_v38  ;;  %v785_v50 = vmax.f32 %v533_v25, %v721_v36 }
 0x13b   : > { %v754_v47 = vmul.f32 0.1, %v664_v39  ;;  %v720_v48 = vmul.f32 0.1, %v528_v44  ;;  %v817_v51 = vmax.f32 %v661_v26, %v753_v37  ;;  %v783_v54 = vmax.f32 %v525_v31, %v719_v42 }
 0x13c   : > { %v752_v49 = vmul.f32 0.1, %v656_v45  ;;  %v786_v52 = vmax.f32 %v536_v38, %v722_v46  ;;  %v815_v55 = vmax.f32 %v653_v32, %v751_v43 }
 0x13d   : > { %v818_v53 = vmax.f32 %v664_v39, %v754_v47  ;;  %v784_v56 = vmax.f32 %v528_v44, %v720_v48  ;;  %v1646_v58 = vpop.f32.mrb[24].mxu0  ;;  %v1678_v59 = vpop.f32.mrb[24].mxu1 }
 0x13e   : > { %v816_v57 = vmax.f32 %v656_v45, %v752_v49  ;;  %v1449_v60 = vpack.c.bf16 %v786_v52, %v785_v50  ;;  %v549_v62 = vadd.f32 %v1646_v58, %v2018_v34  ;;  %v677_v63 = vadd.f32 %v1678_v59, %v2018_v34  ;;  %v540_v0 = vpop.f32.mrb[25].mxu0  ;;  %v668_v1 = vpop.f32.mrb[25].mxu1 }
 0x13f   : > { %v1529_v61 = vpack.c.bf16 %v818_v53, %v817_v51  ;;  %v1444_v2 = vpack.c.bf16 %v784_v56, %v783_v54  ;;  %v541_v4 = vadd.f32 %v2018_v34, %v540_v0  ;;  %v669_v5 = vadd.f32 %v2018_v34, %v668_v1  ;;  %v1647_v6 = vpop.f32.mrb[26].mxu0  ;;  %v1679_v7 = vpop.f32.mrb[26].mxu1 }
 0x140   : > { %v1524_v3 = vpack.c.bf16 %v816_v57, %v815_v55  ;;  %1561 = vst [vmem:[%s2031_s8 + $0x58] sm:$0xff] %v1449_v60   ;;  %v725_v8 = vmul.f32 0.1, %v549_v62  ;;  %v757_v9 = vmul.f32 0.1, %v677_v63  ;;  %v552_v10 = vadd.f32 %v1647_v6, %v2018_v34  ;;  %v543_v12 = vpop.f32.mrb[27].mxu0 }
 0x141   : > { %1577 = vst [vmem:[%s2031_s8 + $0xd8] sm:$0xff] %v1529_v61   ;;  %v680_v11 = vadd.f32 %v1679_v7, %v2018_v34  ;;  %v671_v13 = vpop.f32.mrb[27].mxu1  ;;  %1560 = vst [vmem:[%s2031_s8 + $0x50] sm:$0xff] %v1444_v2   ;;  %v723_v14 = vmul.f32 0.1, %v541_v4  ;;  %v544_v16 = vadd.f32 %v2018_v34, %v543_v12 }
 0x142   : > { %1576 = vst [vmem:[%s2031_s8 + $0xd0] sm:$0xff] %v1524_v3   ;;  %v755_v15 = vmul.f32 0.1, %v669_v5  ;;  %v672_v17 = vadd.f32 %v2018_v34, %v671_v13  ;;  %v726_v18 = vmul.f32 0.1, %v552_v10  ;;  %v789_v22 = vmax.f32 %v549_v62, %v725_v8 }
 0x143   : > { %v758_v19 = vmul.f32 0.1, %v680_v11  ;;  %v724_v20 = vmul.f32 0.1, %v544_v16  ;;  %v821_v23 = vmax.f32 %v677_v63, %v757_v9  ;;  %v787_v26 = vmax.f32 %v541_v4, %v723_v14 }
 0x144   : > { %v756_v21 = vmul.f32 0.1, %v672_v17  ;;  %v790_v24 = vmax.f32 %v552_v10, %v726_v18  ;;  %v819_v27 = vmax.f32 %v669_v5, %v755_v15 }
 0x145   : > { %v822_v25 = vmax.f32 %v680_v11, %v758_v19  ;;  %v788_v28 = vmax.f32 %v544_v16, %v724_v20  ;;  %v1650_v30 = vpop.f32.mrb[28].mxu0  ;;  %v1682_v31 = vpop.f32.mrb[28].mxu1 }
 0x146   : > { %v820_v29 = vmax.f32 %v672_v17, %v756_v21  ;;  %v1459_v32 = vpack.c.bf16 %v790_v24, %v789_v22  ;;  %v565_v35 = vadd.f32 %v1650_v30, %v2018_v34  ;;  %v693_v36 = vadd.f32 %v1682_v31, %v2018_v34  ;;  %v556_v37 = vpop.f32.mrb[29].mxu0  ;;  %v684_v38 = vpop.f32.mrb[29].mxu1 }
 0x147   : > { %v1539_v33 = vpack.c.bf16 %v822_v25, %v821_v23  ;;  %v1454_v39 = vpack.c.bf16 %v788_v28, %v787_v26  ;;  %v557_v41 = vadd.f32 %v2018_v34, %v556_v37  ;;  %v685_v42 = vadd.f32 %v2018_v34, %v684_v38  ;;  %v1651_v43 = vpop.f32.mrb[30].mxu0  ;;  %v1683_v44 = vpop.f32.mrb[30].mxu1 }
 0x148   : > { %v1534_v40 = vpack.c.bf16 %v820_v29, %v819_v27  ;;  %1563 = vst [vmem:[%s2031_s8 + $0x68] sm:$0xff] %v1459_v32   ;;  %v729_v45 = vmul.f32 0.1, %v565_v35  ;;  %v761_v46 = vmul.f32 0.1, %v693_v36  ;;  %v568_v47 = vadd.f32 %v1651_v43, %v2018_v34  ;;  %v559_v49 = vpop.f32.mrb[31].mxu0 }
 0x149   : > { %1579 = vst [vmem:[%s2031_s8 + $0xe8] sm:$0xff] %v1539_v33   ;;  %v696_v48 = vadd.f32 %v1683_v44, %v2018_v34  ;;  %v687_v50 = vpop.f32.mrb[31].mxu1  ;;  %1562 = vst [vmem:[%s2031_s8 + $0x60] sm:$0xff] %v1454_v39   ;;  %v727_v51 = vmul.f32 0.1, %v557_v41  ;;  %v560_v53 = vadd.f32 %v2018_v34, %v559_v49 }
 0x14a   : > { %1578 = vst [vmem:[%s2031_s8 + $0xe0] sm:$0xff] %v1534_v40   ;;  %v759_v52 = vmul.f32 0.1, %v685_v42  ;;  %v688_v54 = vadd.f32 %v2018_v34, %v687_v50  ;;  %v730_v55 = vmul.f32 0.1, %v568_v47  ;;  %v793_v59 = vmax.f32 %v565_v35, %v729_v45 }
 0x14b   : > { %v762_v56 = vmul.f32 0.1, %v696_v48  ;;  %v728_v57 = vmul.f32 0.1, %v560_v53  ;;  %v825_v60 = vmax.f32 %v693_v36, %v761_v46  ;;  %v791_v63 = vmax.f32 %v557_v41, %v727_v51 }
 0x14c   : > { %v760_v58 = vmul.f32 0.1, %v688_v54  ;;  %v794_v61 = vmax.f32 %v568_v47, %v730_v55  ;;  %v823_v0 = vmax.f32 %v685_v42, %v759_v52 }
 0x14d   : > { %v826_v62 = vmax.f32 %v696_v48, %v762_v56  ;;  %v792_v1 = vmax.f32 %v560_v53, %v728_v57 }
 0x14e   : > { %v824_v2 = vmax.f32 %v688_v54, %v760_v58  ;;  %v1469_v3 = vpack.c.bf16 %v794_v61, %v793_v59 }
 0x14f   : > { %v1549_v4 = vpack.c.bf16 %v826_v62, %v825_v60  ;;  %v1464_v5 = vpack.c.bf16 %v792_v1, %v791_v63 }
 0x150   : > { %v1544_v34 = vpack.c.bf16 %v824_v2, %v823_v0  ;;  %1565 = vst [vmem:[%s2031_s8 + $0x78] sm:$0xff] %v1469_v3  }
 0x151   : > { %1581 = vst [vmem:[%s2031_s8 + $0xf8] sm:$0xff] %v1549_v4   ;;  %1564 = vst [vmem:[%s2031_s8 + $0x70] sm:$0xff] %v1464_v5  }
 0x152   : > { %1580 = vst [vmem:[%s2031_s8 + $0xf0] sm:$0xff] %v1544_v34  }
 0x153 PF: > { %p13_p8 = scmp.ge.s32.totalorder %s1840_s17, 4   ;;  %s2141_s12 = smov %s1787_s13 }
 0x154   : > { %s2142_s13 = smov %s1791_s14  ;;  %s2143_s14 = smov %s1850_s20 }
 0x155   : > { %s2144_s15 = smov %s1840_s17  ;;  %15 = sbr.rel (!%p13_p8) target bundleno = 3 (0x3), region = 72 }
 0x15c   :  { %1169 = vsyncpa [#allocation3], 1 }
 0x15d   :  { %1171 = vsyncpa [#allocation3 + $0x1], 1 }

</bundles_post_ra>
